<compile_context>
chip_gen: v7x
topology: tpu7x:2x2x1
jax: 0.10.0
libtpu: 0.0.40
codegen_flags: <defaults>
</compile_context>

<pallas_src>
import numpy as np

import jax
import jax.numpy as jnp
from jax.experimental import pallas as pl
from jax.experimental.pallas import tpu as pltpu

P_DROP = 0.3                                   # matches nn.Dropout(p=0.3)
_KEEP_PROB = 1.0 - P_DROP
_KEEP_THR = np.uint32(round(_KEEP_PROB * 2.0 ** 32))   # P(bits < thr) == keep prob
_INV_KEEP = np.float32(1.0 / _KEEP_PROB)


def _round_up(x, m):
    return (x + m - 1) // m * m


def _body(x_ref, w1_ref, b1_ref, w2_ref, b2_ref, bits_ref, h_ref, logits_ref):
    # --- fc + ReLU (bf16 MXU operands, f32 accumulation) -----------------
    h = jnp.dot(x_ref[...], w1_ref[...],
                preferred_element_type=jnp.float32) + b1_ref[...]
    h = jnp.maximum(h, 0.0)

    # --- dropout: integer threshold compare + single fused scale ---------
    if bits_ref is not None:
        keep = bits_ref[...] < _KEEP_THR
        h = jnp.where(keep, h * _INV_KEEP, 0.0)

    h_ref[...] = h.astype(h_ref.dtype)

    # --- classifier (lane-dense, C padded to 128) -------------------------
    logits = jnp.dot(h.astype(w2_ref.dtype), w2_ref[...],
                     preferred_element_type=jnp.float32) + b2_ref[...]
    logits_ref[...] = logits.astype(logits_ref.dtype)


def _kernel_train(x_ref, w1_ref, b1_ref, w2_ref, b2_ref, bits_ref, h_ref, logits_ref):
    _body(x_ref, w1_ref, b1_ref, w2_ref, b2_ref, bits_ref, h_ref, logits_ref)


def _kernel_eval(x_ref, w1_ref, b1_ref, w2_ref, b2_ref, h_ref, logits_ref):
    _body(x_ref, w1_ref, b1_ref, w2_ref, b2_ref, None, h_ref, logits_ref)


def model_forward(x, w1, b1, w2, b2, *, dropout_key=None, is_training=True):
    """x: (B, F). w1: (F, F), b1: (1, F), w2: (F, C), b2: (1, C) — (in, out) layout.

    Returns (hidden_post_dropout, logits) like the PyTorch Model.forward.
    """
    B, F = x.shape
    C = w2.shape[1]

    # batch tiling (TB multiple of 8; 128 rows once the batch is big enough)
    TB = 128 if B >= 128 else _round_up(B, 8)
    B_pad = _round_up(B, TB)
    # lane-dense classifier output
    C_pad = _round_up(C, 128)

    # bf16 MXU operands; zero-pad batch and classifier columns
    x_p = jnp.zeros((B_pad, F), jnp.bfloat16).at[:B].set(x.astype(jnp.bfloat16))
    w1_b = w1.astype(jnp.bfloat16)
    w2_b = jnp.zeros((F, C_pad), jnp.bfloat16).at[:, :C].set(w2.astype(jnp.bfloat16))
    b1_f = b1.astype(jnp.float32)
    b2_f = jnp.zeros((1, C_pad), jnp.float32).at[:, :C].set(b2.astype(jnp.float32))

    grid = (B_pad // TB,)

    in_specs = [
        pl.BlockSpec((TB, F), lambda i: (i, 0)),       # x tile (pipelined)
        pl.BlockSpec((F, F), lambda i: (0, 0)),        # w1 (VMEM-resident)
        pl.BlockSpec((1, F), lambda i: (0, 0)),        # b1
        pl.BlockSpec((F, C_pad), lambda i: (0, 0)),    # w2 (VMEM-resident)
        pl.BlockSpec((1, C_pad), lambda i: (0, 0)),    # b2
    ]
    args = [x_p, w1_b, b1_f, w2_b, b2_f]

    if is_training:
        if dropout_key is None:
            raise ValueError("dropout_key is required when is_training=True")
        bits = jax.random.bits(dropout_key, (B_pad, F), dtype=jnp.uint32)
        in_specs.append(pl.BlockSpec((TB, F), lambda i: (i, 0)))   # dropout bits tile
        args.append(bits)
        kernel = _kernel_train
    else:
        kernel = _kernel_eval

    out_specs = [
        pl.BlockSpec((TB, F), lambda i: (i, 0)),       # hidden (post-dropout)
        pl.BlockSpec((TB, C_pad), lambda i: (i, 0)),   # logits (lane-dense)
    ]
    out_shape = (
        jax.ShapeDtypeStruct((B_pad, F), jnp.float32),
        jax.ShapeDtypeStruct((B_pad, C_pad), jnp.float32),
    )

    # VMEM budget: resident weights + double-buffered per-tile traffic + headroom
    weight_bytes = w1_b.size * 2 + w2_b.size * 2 + b1_f.size * 4 + b2_f.size * 4
    tile_bytes = TB * F * 2 + TB * F * 4 + TB * C_pad * 4 + (TB * F * 4 if is_training else 0)
    vmem_limit = min(max(2 * (weight_bytes + 2 * tile_bytes) + (8 << 20), 16 << 20), 64 << 20)

    h, logits = pl.pallas_call(
        kernel,
        out_shape=out_shape,
        grid_spec=pltpu.PrefetchScalarGridSpec(
            num_scalar_prefetch=0,
            grid=grid,
            in_specs=in_specs,
            out_specs=out_specs,
        ),
        compiler_params=pltpu.CompilerParams(
            dimension_semantics=("parallel",),   # batch axis -> dual-TC on v7x
            vmem_limit_bytes=vmem_limit,
        ),
    )(*args)

    return h[:B], logits[:B, :C]


def init_params(key, n_feature, n_class):
    """Deterministic init mimicking nn.Linear defaults (uniform +/- 1/sqrt(fan_in))."""
    k1, k2, k3, k4 = jax.random.split(key, 4)
    lim = 1.0 / (n_feature ** 0.5)
    # stored as (in, out) = transposed PyTorch layout
    w1 = jax.random.uniform(k1, (n_feature, n_feature), jnp.float32, -lim, lim)
    b1 = jax.random.uniform(k2, (1, n_feature), jnp.float32, -lim, lim)
    w2 = jax.random.uniform(k3, (n_feature, n_class), jnp.float32, -lim, lim)
    b2 = jax.random.uniform(k4, (1, n_class), jnp.float32, -lim, lim)
    return w1, b1, w2, b2


if __name__ == "__main__":
    key = jax.random.PRNGKey(0)
    B, n_feature, n_class = 8, 32, 8

    kx, kp, kd = jax.random.split(key, 3)
    x = jax.random.normal(kx, (B, n_feature), jnp.float32)
    w1, b1, w2, b2 = init_params(kp, n_feature, n_class)

    # eval-mode forward (no dropout) — check against a pure-JAX bf16 reference
    h_ev, logits_ev = model_forward(x, w1, b1, w2, b2, is_training=False)
    jax.block_until_ready((h_ev, logits_ev))

    xb, w1b, w2b = x.astype(jnp.bfloat16), w1.astype(jnp.bfloat16), w2.astype(jnp.bfloat16)
    h_ref = jnp.maximum(jnp.dot(xb, w1b, preferred_element_type=jnp.float32) + b1, 0.0)
    logits_ref = jnp.dot(h_ref.astype(jnp.bfloat16), w2b,
                         preferred_element_type=jnp.float32) + b2
    assert jnp.allclose(h_ev, h_ref, atol=2e-2, rtol=2e-2)
    assert jnp.allclose(logits_ev, logits_ref, atol=2e-2, rtol=2e-2)

    # training-mode forward (dropout bits drawn host-side, applied in-kernel)
    h_tr, logits_tr = model_forward(x, w1, b1, w2, b2, dropout_key=kd, is_training=True)
    jax.block_until_ready((h_tr, logits_tr))
    assert h_tr.shape == (B, n_feature) and logits_tr.shape == (B, n_class)
    # classifier consistency on the training path (independent of the mask)
    logits_tr_ref = jnp.dot(h_tr.astype(jnp.bfloat16), w2b,
                            preferred_element_type=jnp.float32) + b2
    assert jnp.allclose(logits_tr, logits_tr_ref, atol=2e-2, rtol=2e-2)

    print("KERNEL_OK")
</pallas_src>

<mosaic_0001>
module attributes {stable_mosaic.version = 11 : i64} {
  func.func @_kernel_eval(%arg0: i32, %arg1: memref<8x32xbf16, #tpu.memory_space<vmem>>, %arg2: memref<32x32xbf16, #tpu.memory_space<vmem>>, %arg3: memref<1x32xf32, #tpu.memory_space<vmem>>, %arg4: memref<32x128xbf16, #tpu.memory_space<vmem>>, %arg5: memref<1x128xf32, #tpu.memory_space<vmem>>, %arg6: memref<8x32xf32, #tpu.memory_space<vmem>>, %arg7: memref<8x128xf32, #tpu.memory_space<vmem>>) attributes {dimension_semantics = [#tpu.dimension_semantics<parallel>], iteration_bounds = array<i64: 1>, scalar_prefetch = 0 : i64, scratch_operands = 0 : i64, tpu.core_type = #tpu.core_type<tc>, window_params = [{transform_indices = @transform_0, window_bounds = array<i64: 8, 32>}, {pipeline_mode = #tpu.pipeline_mode<synchronous>, transform_indices = @transform_1, window_bounds = array<i64: 32, 32>}, {pipeline_mode = #tpu.pipeline_mode<synchronous>, transform_indices = @transform_2, window_bounds = array<i64: 1, 32>}, {pipeline_mode = #tpu.pipeline_mode<synchronous>, transform_indices = @transform_3, window_bounds = array<i64: 32, 128>}, {pipeline_mode = #tpu.pipeline_mode<synchronous>, transform_indices = @transform_4, window_bounds = array<i64: 1, 128>}, {transform_indices = @transform_5, window_bounds = array<i64: 8, 32>}, {transform_indices = @transform_6, window_bounds = array<i64: 8, 128>}]} {
    %c0 = arith.constant 0 : index
    %c0_0 = arith.constant 0 : index
    %0 = vector.load %arg1[%c0, %c0_0] : memref<8x32xbf16, #tpu.memory_space<vmem>>, vector<8x32xbf16>
    %c0_1 = arith.constant 0 : index
    %c0_2 = arith.constant 0 : index
    %1 = vector.load %arg2[%c0_1, %c0_2] : memref<32x32xbf16, #tpu.memory_space<vmem>>, vector<32x32xbf16>
    %cst = arith.constant dense<0.000000e+00> : vector<8x32xf32>
    %2 = tpu.matmul %0, %1, %cst {dimension_numbers = #tpu.dot_dimension_numbers<[1], [0], [0], [1], [0, 0, 1, 1], [], []>} : vector<8x32xbf16>, vector<32x32xbf16>, vector<8x32xf32> -> vector<8x32xf32>
    %c0_3 = arith.constant 0 : index
    %c0_4 = arith.constant 0 : index
    %3 = vector.load %arg3[%c0_3, %c0_4] : memref<1x32xf32, #tpu.memory_space<vmem>>, vector<1x32xf32>
    %4 = vector.broadcast %3 : vector<1x32xf32> to vector<8x32xf32>
    %5 = arith.addf %2, %4 : vector<8x32xf32>
    %cst_5 = arith.constant 0.000000e+00 : f32
    %6 = vector.broadcast %cst_5 : f32 to vector<8x32xf32>
    %7 = arith.maximumf %5, %6 : vector<8x32xf32>
    %c0_6 = arith.constant 0 : index
    %c0_7 = arith.constant 0 : index
    %8 = vector.load %arg6[%c0_6, %c0_7] : memref<8x32xf32, #tpu.memory_space<vmem>>, vector<8x32xf32>
    tpu.vector_store %arg6[%c0_6, %c0_7], %7 {strides = array<i32>} : memref<8x32xf32, #tpu.memory_space<vmem>>, vector<8x32xf32>,
    %9 = arith.truncf %7 : vector<8x32xf32> to vector<8x32xbf16>
    %c0_8 = arith.constant 0 : index
    %c0_9 = arith.constant 0 : index
    %10 = vector.load %arg4[%c0_8, %c0_9] : memref<32x128xbf16, #tpu.memory_space<vmem>>, vector<32x128xbf16>
    %cst_10 = arith.constant dense<0.000000e+00> : vector<8x128xf32>
    %11 = tpu.matmul %9, %10, %cst_10 {dimension_numbers = #tpu.dot_dimension_numbers<[1], [0], [0], [1], [0, 0, 1, 1], [], []>} : vector<8x32xbf16>, vector<32x128xbf16>, vector<8x128xf32> -> vector<8x128xf32>
    %c0_11 = arith.constant 0 : index
    %c0_12 = arith.constant 0 : index
    %12 = vector.load %arg5[%c0_11, %c0_12] : memref<1x128xf32, #tpu.memory_space<vmem>>, vector<1x128xf32>
    %13 = vector.broadcast %12 : vector<1x128xf32> to vector<8x128xf32>
    %14 = arith.addf %11, %13 : vector<8x128xf32>
    %c0_13 = arith.constant 0 : index
    %c0_14 = arith.constant 0 : index
    %15 = vector.load %arg7[%c0_13, %c0_14] : memref<8x128xf32, #tpu.memory_space<vmem>>, vector<8x128xf32>
    tpu.vector_store %arg7[%c0_13, %c0_14], %14 {strides = array<i32>} : memref<8x128xf32, #tpu.memory_space<vmem>>, vector<8x128xf32>,
    return
  }
  func.func @transform_0(%arg0: i32) -> (i32, i32) {
    %c0_i32 = arith.constant 0 : i32
    %c0_i32_0 = arith.constant 0 : i32
    return %arg0, %c0_i32 : i32, i32
  }
  func.func @transform_1(%arg0: i32) -> (i32, i32) {
    %c0_i32 = arith.constant 0 : i32
    %c0_i32_0 = arith.constant 0 : i32
    %c0_i32_1 = arith.constant 0 : i32
    return %c0_i32, %c0_i32_0 : i32, i32
  }
  func.func @transform_2(%arg0: i32) -> (i32, i32) {
    %c0_i32 = arith.constant 0 : i32
    %c0_i32_0 = arith.constant 0 : i32
    %c0_i32_1 = arith.constant 0 : i32
    return %c0_i32, %c0_i32_0 : i32, i32
  }
  func.func @transform_3(%arg0: i32) -> (i32, i32) {
    %c0_i32 = arith.constant 0 : i32
    %c0_i32_0 = arith.constant 0 : i32
    %c0_i32_1 = arith.constant 0 : i32
    return %c0_i32, %c0_i32_0 : i32, i32
  }
  func.func @transform_4(%arg0: i32) -> (i32, i32) {
    %c0_i32 = arith.constant 0 : i32
    %c0_i32_0 = arith.constant 0 : i32
    %c0_i32_1 = arith.constant 0 : i32
    return %c0_i32, %c0_i32_0 : i32, i32
  }
  func.func @transform_5(%arg0: i32) -> (i32, i32) {
    %c0_i32 = arith.constant 0 : i32
    %c0_i32_0 = arith.constant 0 : i32
    return %arg0, %c0_i32 : i32, i32
  }
  func.func @transform_6(%arg0: i32) -> (i32, i32) {
    %c0_i32 = arith.constant 0 : i32
    %c0_i32_0 = arith.constant 0 : i32
    return %arg0, %c0_i32 : i32, i32
  }
}

</mosaic_0001>

<bundles_post_ra>
// kernel: tpu_custom_call.1
= control target key start
LH: loop header
LB: loop body
LE: loop exit
PB: predicated region body
PF: predicated region fallthrough
CT: control target
= control target key end

     0   :  { %12 = vsyncpa [#allocation3], 0  ;;  %s512_s0 = inlined_call_operand.hbm [shape: bf16[8,32], index: 0, kind: input, shape index: {}]   ;;  %s513_s1 = inlined_call_operand.hbm [shape: bf16[32,32], index: 1, kind: input, shape index: {}]   ;;  %s514_s2 = inlined_call_operand.vmem [shape: f32[1,32], index: 2, kind: input, shape index: {}]   ;;  %s515_s3 = inlined_call_operand.hbm [shape: bf16[32,128], index: 3, kind: input, shape index: {}]   ;;  %s516_s4 = inlined_call_operand.vmem [shape: f32[1,128], index: 4, kind: input, shape index: {}]   ;;  %s517_s5 = inlined_call_operand.hbm [shape: f32[8,32], index: 5, kind: output, shape index: {0}]   ;;  %s518_s6 = inlined_call_operand.hbm [shape: f32[8,128], index: 6, kind: output, shape index: {1}]  }
   0x1   :  { %13 = vsyncpa [#allocation6], 0 }
   0x2   :  { %14 = vsyncpa [#allocation4], 0 }
   0x3   :  { %15 = vsyncpa [#allocation10], 0  ;;  %s393_s21 = smov [#allocation5]   ;;  %s275_s25 = scalar_lea.hbm %s513_s1, 256 }
   0x4   :  { %s31_s22 = sshll.u32 %s393_s21, 4  ;;  %p276_p0 = scmp.ne.s32.totalorder %s513_s1, %s275_s25  ;;  %s32_s22 = int_to_ptr.vmem [resolvable:$true] %s31_s22 }
   0x5   :  { %p279_p1 = scmp.lt.u32.totalorder %s275_s25, %s513_s1 }
   0x7   :  { %p281_p2 = pnand %p279_p1, %p276_p0 }
   0x9   :  { %284 = shalt.err (!%p281_p2)
}
   0xa   :  { %s285_s30 = scalar_lea.vmem %s32_s22, 256  ;;  %p290_p4 = scmp.lt.s32.totalorder %s32_s22, %s32_s22 }
   0xb   :  { %p286_p3 = scmp.ne.s32.totalorder %s32_s22, %s285_s30  ;;  %p291_p5 = scmp.lt.s32.totalorder %s285_s30, %s285_s30 }
   0xd   :  { %p292_p6 = por %p291_p5, %p290_p4 }
   0xf   :  { %p293_p7 = pnand %p292_p6, %p286_p3 }
  0x11   :  { %296 = shalt.err (!%p293_p7)
}
  0x12   :  { %s394_s7 = smov 64   ;;  %s395_s8 = smov 4  }
  0x13   :  { %37 = dma.hbm_to_vmem [thread:$0]  %s513_s1, 256, %s32_s22, [#allocation6], %s394_s7, %s394_s7, %s395_s8  }
  0x14   :  { %s396_s11 = smov [#allocation2]   ;;  %s397_s13 = smov [#allocation7]  }
  0x15   :  { %s22_s12 = sshll.u32 %s396_s11, 4  ;;  %s45_s14 = sshll.u32 %s397_s13, 4  ;;  %s23_s12 = int_to_ptr.vmem [resolvable:$true] %s22_s12  ;;  %s46_s14 = int_to_ptr.vmem [resolvable:$true] %s45_s14 }
  0x16   :  { %s297_s17 = scalar_lea.hbm %s512_s0, 64 }
  0x17   :  { %p298_p8 = scmp.ne.s32.totalorder %s512_s0, %s297_s17  ;;  %p301_p9 = scmp.lt.u32.totalorder %s297_s17, %s512_s0 }
  0x19   :  { %p303_p10 = pnand %p301_p9, %p298_p8 }
  0x1b   :  { %306 = shalt.err (!%p303_p10)
}
  0x1c   :  { %s307_s1 = scalar_lea.vmem %s23_s12, 64  ;;  %p312_p12 = scmp.lt.s32.totalorder %s23_s12, %s23_s12 }
  0x1d   :  { %p308_p11 = scmp.ne.s32.totalorder %s23_s12, %s307_s1  ;;  %p313_p13 = scmp.lt.s32.totalorder %s307_s1, %s307_s1 }
  0x1f   :  { %p314_p0 = por %p313_p13, %p312_p12 }
  0x21   :  { %p315_p1 = pnand %p314_p0, %p308_p11 }
  0x23   :  { %318 = shalt.err (!%p315_p1)
}
  0x24   :  { %25 = dma.hbm_to_vmem [thread:$0]  %s512_s0, 64, %s23_s12, [#allocation3]  }
  0x25   :  { %s319_s26 = scalar_lea.hbm %s515_s3, 256 }
  0x26   :  { %p320_p2 = scmp.ne.s32.totalorder %s515_s3, %s319_s26  ;;  %p323_p3 = scmp.lt.u32.totalorder %s319_s26, %s515_s3 }
  0x28   :  { %p325_p4 = pnand %p323_p3, %p320_p2 }
  0x2a   :  { %328 = shalt.err (!%p325_p4)
}
  0x2b   :  { %s329_s9 = scalar_lea.vmem %s46_s14, 256  ;;  %p334_p6 = scmp.lt.s32.totalorder %s46_s14, %s46_s14 }
  0x2c   :  { %p330_p5 = scmp.ne.s32.totalorder %s46_s14, %s329_s9  ;;  %p335_p7 = scmp.lt.s32.totalorder %s329_s9, %s329_s9 }
  0x2e   :  { %p336_p8 = por %p335_p7, %p334_p6 }
  0x30   :  { %p337_p9 = pnand %p336_p8, %p330_p5 }
  0x32   :  { %340 = shalt.err (!%p337_p9)
}
  0x33   :  { %51 = dma.hbm_to_vmem [thread:$0]  %s515_s3, 256, %s46_s14, [#allocation6], %s394_s7, %s394_s7, %s395_s8  }
  0x34   :  { %385 = dma.done.wait [#allocation3], 64  }
  0x35   :  { %386 = vsyncadd [#allocation3], 4294967232 }
  0x36   :  { %387 = dma.done.wait [#allocation6], 512  }
  0x37   :  { %388 = vsyncadd [#allocation6], 4294966784  ;;  %v398_v0 = vmov 0.0   ;;  %vm399_vm0 = vmmov 0   ;;  %v271_v1 = vld [vmem:[#allocation5] sm:$0xff]   ;;  %v272_v2 = vld [vmem:[#allocation5 + $0x8] sm:$0xff]  }
  0x38   :  { %246 = vmatprep.subr.bf16.mxu0 %v398_v0  ;;  %250 = vmatprep.mubr.msk.bf16.mxu0 %vm399_vm0, %v398_v0  ;;  %v64_v3 = vld [vmem:[#allocation2] sm:$0xf]  ;;  %vm88_vm1 = vcmask 261120   ;;  %v273_v4 = vld [vmem:[#allocation7] sm:$0xff]   ;;  %s400_s8 = smov [#allocation8]  }
  0x39   :  { %254 = vmatprep.subr.bf16.mxu1 %v398_v0  ;;  %258 = vmatprep.mubr.msk.bf16.mxu1 %vm399_vm0, %v398_v0  ;;  %v274_v5 = vld [vmem:[#allocation7 + $0x8] sm:$0xff]   ;;  %s208_s11 = sshll.u32 %s400_s8, 4  ;;  %s209_s11 = int_to_ptr.vmem [resolvable:$true] %s208_s11 }
  0x3a   :  { %247 = vmatpush3.bf16.msra.mxu0 %v271_v1  ;;  %255 = vmatpush3.bf16.msra.mxu1 %v273_v4  ;;  %v232_v6 = vld [vmem:[%s514_s2] ss:$0 sm:$0xff]  ;;  %s341_s12 = scalar_lea.vmem %s209_s11, 128  ;;  %p346_p11 = scmp.lt.s32.totalorder %s209_s11, %s209_s11 }
  0x3b   :  { %248 = vmatprep.subr.bf16.mxu0 %v398_v0  ;;  %256 = vmatprep.subr.bf16.mxu1 %v398_v0  ;;  %p342_p10 = scmp.ne.s32.totalorder %s209_s11, %s341_s12  ;;  %p347_p12 = scmp.lt.s32.totalorder %s341_s12, %s341_s12 }
  0x3d   :  { %p348_p13 = por %p347_p12, %p346_p11 }
  0x3e   :  { %249 = vmatpush3.bf16.msra.mxu0 %v272_v2  ;;  %257 = vmatpush3.bf16.msra.mxu1 %v274_v5 }
  0x3f   :  { %p349_p0 = pnand %p348_p13, %p342_p10 }
  0x41   :  { %251 = vmatmul.mubr.msk.bf16.vlgmr.msra.gmra.mrb[0].mxu0 %vm88_vm1, %v64_v3 }
 0x114   :  { %v126_v7 = vpop.f32.mrb[0].mxu0 }
 0x115   :  { %v127_v8 = vadd.f32 %v232_v6, %v126_v7  ;;  %v252_v9 = vpop.f32.mrb[1].mxu0 }
 0x116   :  { %v129_v10 = vpop.f32.mrb[2].mxu0 }
 0x117   :  { %v132_v11 = vmax.f32 %v127_v8, 0.0  ;;  %v253_v12 = vpop.f32.mrb[3].mxu0 }
 0x119   :  { %v134_v13 = vpack.c.bf16 %v132_v11, %v132_v11  ;;  %133 = vst.msk [vmem:[#allocation8] sm:$0xff] %vm88_vm1, %v132_v11 }
 0x11b   :  { %259 = vmatmul.mubr.msk.bf16.vlgmr.msra.gmra.mrb[0].mxu1 %vm88_vm1, %v134_v13 }
 0x11c   :  { %352 = shalt.err (!%p349_p0)
}
 0x11d   :  { %s353_s14 = scalar_lea.hbm %s517_s5, 128 }
 0x11e   :  { %p354_p1 = scmp.ne.s32.totalorder %s517_s5, %s353_s14  ;;  %p357_p2 = scmp.lt.u32.totalorder %s353_s14, %s517_s5 }
 0x120   :  { %p359_p3 = pnand %p357_p2, %p354_p1 }
 0x122   :  { %362 = shalt.err (!%p359_p3)
}
 0x123   :  { %211 = dma.vmem_to_hbm [thread:$0]  %s209_s11, 128, %s517_s5, [#allocation4]   ;;  %v236_v14 = vld [vmem:[%s516_s4] ss:$0 sm:$0xff] }
 0x124   :  { %s401_s22 = smov [#allocation9]  }
 0x125   :  { %s218_s23 = sshll.u32 %s401_s22, 4  ;;  %s219_s23 = int_to_ptr.vmem [resolvable:$true] %s218_s23 }
 0x126   :  { %s363_s24 = scalar_lea.vmem %s219_s23, 128  ;;  %p368_p5 = scmp.lt.s32.totalorder %s219_s23, %s219_s23 }
 0x127   :  { %p364_p4 = scmp.ne.s32.totalorder %s219_s23, %s363_s24  ;;  %p369_p6 = scmp.lt.s32.totalorder %s363_s24, %s363_s24 }
 0x129   :  { %p370_p7 = por %p369_p6, %p368_p5 }
 0x12b   :  { %p371_p8 = pnand %p370_p7, %p364_p4 }
 0x1ee   :  { %v195_v15 = vpop.f32.mrb[0].mxu1 }
 0x1ef   :  { %v196_v16 = vadd.f32 %v236_v14, %v195_v15  ;;  %v260_v17 = vpop.f32.mrb[1].mxu1 }
 0x1f0   :  { %v198_v18 = vpop.f32.mrb[2].mxu1 }
 0x1f1   :  { %201 = vst [vmem:[#allocation9] sm:$0xff] %v196_v16  ;;  %v261_v19 = vpop.f32.mrb[3].mxu1 }
 0x1f2   :  { %374 = shalt.err (!%p371_p8)
}
 0x1f3   :  { %s375_s4 = scalar_lea.hbm %s518_s6, 128 }
 0x1f4   :  { %p376_p9 = scmp.ne.s32.totalorder %s518_s6, %s375_s4  ;;  %p379_p10 = scmp.lt.u32.totalorder %s375_s4, %s518_s6 }
 0x1f6   :  { %p381_p11 = pnand %p379_p10, %p376_p9 }
 0x1f8   :  { %384 = shalt.err (!%p381_p11)
}
 0x1f9   :  { %221 = dma.vmem_to_hbm [thread:$0]  %s219_s23, 128, %s518_s6, [#allocation10]  }
 0x1fa   :  { %389 = dma.done.wait [#allocation4], 128  }
 0x1fb   :  { %390 = vsyncadd [#allocation4], 4294967168 }
 0x1fc   :  { %391 = dma.done.wait [#allocation10], 128  }
 0x1fd   :  { %392 = vsyncadd [#allocation10], 4294967168 }
 0x1fe   :  { %228 = vsyncpa [#allocation3], 1 }
 0x1ff   :  { %229 = vsyncpa [#allocation6], 1 }
 0x200   :  { %230 = vsyncpa [#allocation4], 1 }
 0x201   :  { %231 = vsyncpa [#allocation10], 1 }

</bundles_post_ra>
